<compile_context>
chip_gen: v7x
topology: tpu7x:2x2x1
jax: 0.10.0
libtpu: 0.0.40
codegen_flags: <defaults>
</compile_context>

<pallas_src>
import functools

import jax
import jax.numpy as jnp
from jax.experimental import pallas as pl
from jax.experimental.pallas import tpu as pltpu


def _round_up(x: int, m: int) -> int:
    return ((x + m - 1) // m) * m


def _coupling_kernel(z_ref, ldj_ref,
                     w1_ref, b1_ref,          # fused layer-1 (stacked): [L, Dh, 2H], [L, 1, 2H]
                     w2_ref, b2_ref,          # block-diag layer-2 (stacked): [L, 2H, 2Dh], [L, 1, 2Dh]
                     sf_ref, isf_ref,         # exp(sf), exp(-sf) (stacked): [L, 1, Dh]
                     zout_ref, ldj_out_ref,
                     *, inverts, mm_dtype):
    D = z_ref.shape[1]
    Dh = D // 2

    z = z_ref[...]                            # [tb, D] f32
    left = z[:, :Dh]
    right = z[:, Dh:]
    ldj_delta = jnp.zeros((z.shape[0], 1), jnp.float32)

    # Static unrolled loop over fused coupling layers; z tile stays resident.
    for l, inv in enumerate(inverts):
        # invert=False: left half (z2) is transformed, right half (z1) feeds the nets.
        # invert=True : right half (z2) is transformed, left half (z1) feeds the nets.
        passive = left if inv else right      # z1 (network input, passed through)
        active = right if inv else left       # z2 (affinely transformed)

        # fused first layer (scale | translate): one K=Dh, N=2H matmul
        h = jnp.dot(passive.astype(mm_dtype), w1_ref[l],
                    preferred_element_type=jnp.float32) + b1_ref[l]
        h = jnp.maximum(h, 0.0)

        # fused block-diagonal second layer: one K=2H, N=2*Dh matmul
        st = jnp.dot(h.astype(mm_dtype), w2_ref[l],
                     preferred_element_type=jnp.float32) + b2_ref[l]
        s = st[:, :Dh]
        t = st[:, Dh:]

        # scaling-factor stabilized tanh (exp's precomputed in the wrapper)
        s = jnp.tanh(s * isf_ref[l]) * sf_ref[l]

        active = (active + t) * jnp.exp(s)
        ldj_delta = ldj_delta + jnp.sum(s, axis=1, keepdims=True)

        if inv:
            right = active
        else:
            left = active

    zout_ref[...] = jnp.concatenate([left, right], axis=1)   # single full-block store
    ldj_out_ref[...] = ldj_ref[...] + ldj_delta


def _prep_layer(weights, mm_dtype):
    """PyTorch-layout ([out, in]) params -> fused/transposed kernel operands."""
    sw1, sb1, sw2, sb2 = weights['scale_net']
    tw1, tb1, tw2, tb2 = weights['translate_net']
    sf = weights['scaling_factor'][0]
    H, Dh = sw1.shape

    w1 = jnp.concatenate([sw1.T, tw1.T], axis=1).astype(mm_dtype)            # [Dh, 2H]
    b1 = jnp.concatenate([sb1, tb1]).reshape(1, 2 * H).astype(jnp.float32)   # [1, 2H]

    w2 = jnp.zeros((2 * H, 2 * Dh), jnp.float32)                             # block-diag
    w2 = w2.at[:H, :Dh].set(sw2.T).at[H:, Dh:].set(tw2.T).astype(mm_dtype)   # [2H, 2Dh]
    b2 = jnp.concatenate([sb2, tb2]).reshape(1, 2 * Dh).astype(jnp.float32)  # [1, 2Dh]

    sfac = jnp.exp(sf).reshape(1, Dh).astype(jnp.float32)
    isfac = jnp.exp(-sf).reshape(1, Dh).astype(jnp.float32)
    return w1, b1, w2, b2, sfac, isfac


def main_coupling_flow_forward(z, ldj, layer_weights, inverts, *,
                               use_bf16=True, tile_b=1024):
    """Fused forward (reverse=False) through a stack of MainCouplingLayers.

    z: [B, D], ldj: [B], layer_weights: list of per-layer weight dicts,
    inverts: list of per-layer `invert` flags (static).
    """
    B, D = z.shape
    assert D % 2 == 0, "input_dim must be even"
    Dh = D // 2
    L = len(layer_weights)
    assert len(inverts) == L and L >= 1

    mm_dtype = jnp.bfloat16 if use_bf16 else jnp.float32
    prepped = [_prep_layer(w, mm_dtype) for w in layer_weights]
    w1 = jnp.stack([p[0] for p in prepped])    # [L, Dh, 2H]
    b1 = jnp.stack([p[1] for p in prepped])    # [L, 1, 2H]
    w2 = jnp.stack([p[2] for p in prepped])    # [L, 2H, 2Dh]
    b2 = jnp.stack([p[3] for p in prepped])    # [L, 1, 2Dh]
    sf = jnp.stack([p[4] for p in prepped])    # [L, 1, Dh]
    isf = jnp.stack([p[5] for p in prepped])   # [L, 1, Dh]
    H2 = w1.shape[-1]                          # 2 * hidden
    assert H2 % 256 == 0, "hidden width must be a multiple of 128"

    # ---- VMEM-aware batch tile (sublane aligned, ragged last block handled by Pallas)
    tb = _round_up(min(tile_b, B), 8)
    lane_D = max(_round_up(D, 128), 128)
    # z in/out + lane-padded ldj in/out, each double-buffered, f32:
    row_bytes = 2 * 2 * (lane_D + 128) * 4
    data_budget = 24 << 20                     # fits comfortably inside v7x's 64 MiB/TC
    tb = min(tb, max(8, (data_budget // row_bytes) // 8 * 8))
    if B > tb:                                 # keep >=4 grid steps so v7x's 2 TCs share work
        tb = min(tb, max(8, _round_up(pl.cdiv(B, 4), 8)))
    grid = (pl.cdiv(B, tb),)

    w_bytes = sum(int(a.size) * a.dtype.itemsize for a in (w1, b1, w2, b2, sf, isf))
    tmp_bytes = tb * (H2 + 2 * Dh + 2 * lane_D) * 4
    vmem_limit = int(min(48 << 20,
                         max(16 << 20, tb * row_bytes + 2 * w_bytes + tmp_bytes + (4 << 20))))

    z32 = z.astype(jnp.float32)
    ldj2 = ldj.astype(jnp.float32).reshape(B, 1)

    def batch_spec(shape):
        return pl.BlockSpec(shape, lambda i: (i, 0))

    def const_spec(arr):
        return pl.BlockSpec(arr.shape, lambda i: (0,) * arr.ndim)

    cost = pl.CostEstimate(
        flops=int(L * 12 * B * (H2 // 2) * Dh),
        transcendentals=int(L * 2 * B * Dh),
        bytes_accessed=int(4 * (2 * B * D + 2 * B)) + int(w_bytes),
    )

    kernel = functools.partial(_coupling_kernel,
                               inverts=tuple(bool(i) for i in inverts),
                               mm_dtype=mm_dtype)

    z_out, ldj_out = pl.pallas_call(
        kernel,
        out_shape=(
            jax.ShapeDtypeStruct((B, D), jnp.float32),
            jax.ShapeDtypeStruct((B, 1), jnp.float32),
        ),
        grid=grid,
        in_specs=[
            batch_spec((tb, D)),      # z
            batch_spec((tb, 1)),      # ldj
            const_spec(w1), const_spec(b1),
            const_spec(w2), const_spec(b2),
            const_spec(sf), const_spec(isf),
        ],
        out_specs=(
            batch_spec((tb, D)),
            batch_spec((tb, 1)),
        ),
        input_output_aliases={0: 0, 1: 1},     # update flow state in place when possible
        compiler_params=pltpu.CompilerParams(
            dimension_semantics=("parallel",),
            vmem_limit_bytes=vmem_limit,
        ),
        cost_estimate=cost,
    )(z32, ldj2, w1, b1, w2, b2, sf, isf)

    return z_out, ldj_out[:, 0]


def main_coupling_layer_forward(z, ldj, weights, *, invert=False,
                                use_bf16=True, tile_b=1024):
    """Single MainCouplingLayer forward (reverse=False)."""
    return main_coupling_flow_forward(z, ldj, [weights], [invert],
                                      use_bf16=use_bf16, tile_b=tile_b)


def _reference_layer(z, ldj, weights, invert=False):
    """Pure-JAX reference mirroring the PyTorch forward (reverse=False)."""
    B, D = z.shape
    Dh = D // 2
    if invert:
        z1, z2 = z[:, :Dh], z[:, Dh:]
    else:
        z2, z1 = z[:, :Dh], z[:, Dh:]
    sw1, sb1, sw2, sb2 = weights['scale_net']
    tw1, tb1, tw2, tb2 = weights['translate_net']
    sf = weights['scaling_factor'][0]

    def mlp(x, w1, b1, w2, b2):
        h = jnp.maximum(x @ w1.T + b1, 0.0)
        return h @ w2.T + b2

    s = mlp(z1, sw1, sb1, sw2, sb2)
    t = mlp(z1, tw1, tb1, tw2, tb2)
    s_fac = jnp.exp(sf)[None, :]
    s = jnp.tanh(s / s_fac) * s_fac
    z2 = (z2 + t) * jnp.exp(s)
    ldj = ldj + jnp.sum(s, axis=1)
    if invert:
        z_out = jnp.concatenate([z1, z2], axis=1)
    else:
        z_out = jnp.concatenate([z2, z1], axis=1)
    return z_out, ldj


def _make_layer_weights(key, Dh, hidden):
    ks = jax.random.split(key, 9)
    scale_net = (
        jax.random.normal(ks[0], (hidden, Dh), jnp.float32) * 0.05,
        jax.random.normal(ks[1], (hidden,), jnp.float32) * 0.01,
        jax.random.normal(ks[2], (Dh, hidden), jnp.float32) * 0.05,
        jax.random.normal(ks[3], (Dh,), jnp.float32) * 0.01,
    )
    translate_net = (
        jax.random.normal(ks[4], (hidden, Dh), jnp.float32) * 0.05,
        jax.random.normal(ks[5], (hidden,), jnp.float32) * 0.01,
        jax.random.normal(ks[6], (Dh, hidden), jnp.float32) * 0.05,
        jax.random.normal(ks[7], (Dh,), jnp.float32) * 0.01,
    )
    scaling_factor = (jax.random.normal(ks[8], (Dh,), jnp.float32) * 0.1,)
    return {'scale_net': scale_net, 'translate_net': translate_net,
            'scaling_factor': scaling_factor}


if __name__ == "__main__":
    B = 8
    input_dim = 64
    Dh = input_dim // 2
    hidden = 128          # fixed by the module (hidden_layers=[128])
    L = 3

    key = jax.random.PRNGKey(0)
    k_layers, k_z, k_ldj, k_zbig = jax.random.split(key, 4)
    layer_keys = jax.random.split(k_layers, L)
    layers = [_make_layer_weights(k, Dh, hidden) for k in layer_keys]
    inverts = [bool(i % 2) for i in range(L)]   # alternating, as in a flow stack

    z = jax.random.normal(k_z, (B, input_dim), jnp.float32)
    ldj = jax.random.normal(k_ldj, (B,), jnp.float32)

    # ---- single layer, f32 MXU path ----
    z_ref, ldj_ref = _reference_layer(z, ldj, layers[0], invert=False)
    z_out, ldj_out = main_coupling_layer_forward(z, ldj, layers[0], use_bf16=False)
    jax.block_until_ready((z_out, ldj_out))
    assert jnp.allclose(z_out, z_ref, atol=1e-3, rtol=1e-3), "z mismatch (f32)"
    assert jnp.allclose(ldj_out, ldj_ref, atol=1e-3, rtol=1e-3), "ldj mismatch (f32)"

    # ---- single layer, bf16 MXU operands (default) ----
    z_bf, ldj_bf = main_coupling_layer_forward(z, ldj, layers[0], use_bf16=True)
    jax.block_until_ready((z_bf, ldj_bf))
    assert jnp.allclose(z_bf, z_ref, atol=5e-2, rtol=5e-2), "z mismatch (bf16)"
    assert jnp.allclose(ldj_bf, ldj_ref, atol=5e-2, rtol=5e-2), "ldj mismatch (bf16)"

    # ---- fused multi-layer flow, non-tile-divisible batch (ragged last block) ----
    B2 = 200
    z_big = jax.random.normal(k_zbig, (B2, input_dim), jnp.float32)
    ldj_big = jnp.zeros((B2,), jnp.float32)
    zr, lr = z_big, ldj_big
    for wts, inv in zip(layers, inverts):
        zr, lr = _reference_layer(zr, lr, wts, invert=inv)
    zo, lo = main_coupling_flow_forward(z_big, ldj_big, layers, inverts,
                                        use_bf16=False, tile_b=64)
    jax.block_until_ready((zo, lo))
    assert zo.shape == (B2, input_dim) and lo.shape == (B2,)
    assert jnp.allclose(zo, zr, atol=2e-3, rtol=2e-3), "z mismatch (fused flow)"
    assert jnp.allclose(lo, lr, atol=2e-3, rtol=2e-3), "ldj mismatch (fused flow)"

    print("KERNEL_OK")
</pallas_src>

<mosaic_0001>
module attributes {stable_mosaic.version = 11 : i64} {
  func.func @_coupling_kernel(%arg0: i32, %arg1: memref<8x64xf32, #tpu.memory_space<vmem>>, %arg2: memref<8x1xf32, #tpu.memory_space<vmem>>, %arg3: memref<1x32x256xf32, #tpu.memory_space<vmem>>, %arg4: memref<1x1x256xf32, #tpu.memory_space<vmem>>, %arg5: memref<1x256x64xf32, #tpu.memory_space<vmem>>, %arg6: memref<1x1x64xf32, #tpu.memory_space<vmem>>, %arg7: memref<1x1x32xf32, #tpu.memory_space<vmem>>, %arg8: memref<1x1x32xf32, #tpu.memory_space<vmem>>, %arg9: memref<8x64xf32, #tpu.memory_space<vmem>>, %arg10: memref<8x1xf32, #tpu.memory_space<vmem>>) attributes {dimension_semantics = [#tpu.dimension_semantics<parallel>], iteration_bounds = array<i64: 1>, scalar_prefetch = 0 : i64, scratch_operands = 0 : i64, tpu.core_type = #tpu.core_type<tc>, window_params = [{transform_indices = @transform_0, window_bounds = array<i64: 8, 64>}, {transform_indices = @transform_1, window_bounds = array<i64: 8, 1>}, {pipeline_mode = #tpu.pipeline_mode<synchronous>, transform_indices = @transform_2, window_bounds = array<i64: 1, 32, 256>}, {pipeline_mode = #tpu.pipeline_mode<synchronous>, transform_indices = @transform_3, window_bounds = array<i64: 1, 1, 256>}, {pipeline_mode = #tpu.pipeline_mode<synchronous>, transform_indices = @transform_4, window_bounds = array<i64: 1, 256, 64>}, {pipeline_mode = #tpu.pipeline_mode<synchronous>, transform_indices = @transform_5, window_bounds = array<i64: 1, 1, 64>}, {pipeline_mode = #tpu.pipeline_mode<synchronous>, transform_indices = @transform_6, window_bounds = array<i64: 1, 1, 32>}, {pipeline_mode = #tpu.pipeline_mode<synchronous>, transform_indices = @transform_7, window_bounds = array<i64: 1, 1, 32>}, {transform_indices = @transform_8, window_bounds = array<i64: 8, 64>}, {transform_indices = @transform_9, window_bounds = array<i64: 8, 1>}]} {
    %c0 = arith.constant 0 : index
    %c0_0 = arith.constant 0 : index
    %0 = vector.load %arg1[%c0, %c0_0] : memref<8x64xf32, #tpu.memory_space<vmem>>, vector<8x64xf32>
    %1 = vector.extract_strided_slice %0 {offsets = [0, 0], sizes = [8, 32], strides = [1, 1]} : vector<8x64xf32> to vector<8x32xf32>
    %2 = vector.extract_strided_slice %0 {offsets = [0, 32], sizes = [8, 32], strides = [1, 1]} : vector<8x64xf32> to vector<8x32xf32>
    %cst = arith.constant 0.000000e+00 : f32
    %3 = vector.broadcast %cst : f32 to vector<8x1xf32>
    %c0_1 = arith.constant 0 : index
    %c0_2 = arith.constant 0 : index
    %c0_3 = arith.constant 0 : index
    %4 = vector.load %arg3[%c0_1, %c0_2, %c0_3] : memref<1x32x256xf32, #tpu.memory_space<vmem>>, vector<1x32x256xf32>
    %5 = vector.shape_cast %4 : vector<1x32x256xf32> to vector<32x256xf32>
    %cst_4 = arith.constant dense<0.000000e+00> : vector<8x256xf32>
    %6 = tpu.matmul %2, %5, %cst_4 {dimension_numbers = #tpu.dot_dimension_numbers<[1], [0], [0], [1], [0, 0, 1, 1], [], []>} : vector<8x32xf32>, vector<32x256xf32>, vector<8x256xf32> -> vector<8x256xf32>
    %c0_5 = arith.constant 0 : index
    %c0_6 = arith.constant 0 : index
    %c0_7 = arith.constant 0 : index
    %7 = vector.load %arg4[%c0_5, %c0_6, %c0_7] : memref<1x1x256xf32, #tpu.memory_space<vmem>>, vector<1x1x256xf32>
    %8 = vector.shape_cast %7 : vector<1x1x256xf32> to vector<1x256xf32>
    %9 = vector.broadcast %8 : vector<1x256xf32> to vector<8x256xf32>
    %10 = arith.addf %6, %9 : vector<8x256xf32>
    %cst_8 = arith.constant 0.000000e+00 : f32
    %11 = vector.broadcast %cst_8 : f32 to vector<8x256xf32>
    %12 = arith.maximumf %10, %11 : vector<8x256xf32>
    %c0_9 = arith.constant 0 : index
    %c0_10 = arith.constant 0 : index
    %c0_11 = arith.constant 0 : index
    %13 = vector.load %arg5[%c0_9, %c0_10, %c0_11] : memref<1x256x64xf32, #tpu.memory_space<vmem>>, vector<1x256x64xf32>
    %14 = vector.shape_cast %13 : vector<1x256x64xf32> to vector<256x64xf32>
    %cst_12 = arith.constant dense<0.000000e+00> : vector<8x64xf32>
    %15 = tpu.matmul %12, %14, %cst_12 {dimension_numbers = #tpu.dot_dimension_numbers<[1], [0], [0], [1], [0, 0, 1, 1], [], []>} : vector<8x256xf32>, vector<256x64xf32>, vector<8x64xf32> -> vector<8x64xf32>
    %c0_13 = arith.constant 0 : index
    %c0_14 = arith.constant 0 : index
    %c0_15 = arith.constant 0 : index
    %16 = vector.load %arg6[%c0_13, %c0_14, %c0_15] : memref<1x1x64xf32, #tpu.memory_space<vmem>>, vector<1x1x64xf32>
    %17 = vector.shape_cast %16 : vector<1x1x64xf32> to vector<1x64xf32>
    %18 = vector.broadcast %17 : vector<1x64xf32> to vector<8x64xf32>
    %19 = arith.addf %15, %18 : vector<8x64xf32>
    %20 = vector.extract_strided_slice %19 {offsets = [0, 0], sizes = [8, 32], strides = [1, 1]} : vector<8x64xf32> to vector<8x32xf32>
    %21 = vector.extract_strided_slice %19 {offsets = [0, 32], sizes = [8, 32], strides = [1, 1]} : vector<8x64xf32> to vector<8x32xf32>
    %c0_16 = arith.constant 0 : index
    %c0_17 = arith.constant 0 : index
    %c0_18 = arith.constant 0 : index
    %22 = vector.load %arg8[%c0_16, %c0_17, %c0_18] : memref<1x1x32xf32, #tpu.memory_space<vmem>>, vector<1x1x32xf32>
    %23 = vector.shape_cast %22 : vector<1x1x32xf32> to vector<1x32xf32>
    %24 = vector.broadcast %23 : vector<1x32xf32> to vector<8x32xf32>
    %25 = arith.mulf %20, %24 : vector<8x32xf32>
    %26 = math.tanh %25 : vector<8x32xf32>
    %c0_19 = arith.constant 0 : index
    %c0_20 = arith.constant 0 : index
    %c0_21 = arith.constant 0 : index
    %27 = vector.load %arg7[%c0_19, %c0_20, %c0_21] : memref<1x1x32xf32, #tpu.memory_space<vmem>>, vector<1x1x32xf32>
    %28 = vector.shape_cast %27 : vector<1x1x32xf32> to vector<1x32xf32>
    %29 = vector.broadcast %28 : vector<1x32xf32> to vector<8x32xf32>
    %30 = arith.mulf %26, %29 : vector<8x32xf32>
    %31 = arith.addf %1, %21 : vector<8x32xf32>
    %32 = math.exp %30 : vector<8x32xf32>
    %33 = arith.mulf %31, %32 : vector<8x32xf32>
    %cst_22 = arith.constant dense<0.000000e+00> : vector<8xf32>
    %34 = vector.multi_reduction <add>, %30, %cst_22 [1] : vector<8x32xf32> to vector<8xf32>
    %35 = vector.shape_cast %34 : vector<8xf32> to vector<8x1xf32>
    %36 = arith.addf %3, %35 : vector<8x1xf32>
    %37 = tpu.concatenate %33, %2 in 1 : vector<8x32xf32>, vector<8x32xf32> -> vector<8x64xf32>
    %c0_23 = arith.constant 0 : index
    %c0_24 = arith.constant 0 : index
    %38 = vector.load %arg9[%c0_23, %c0_24] : memref<8x64xf32, #tpu.memory_space<vmem>>, vector<8x64xf32>
    tpu.vector_store %arg9[%c0_23, %c0_24], %37 {strides = array<i32>} : memref<8x64xf32, #tpu.memory_space<vmem>>, vector<8x64xf32>,
    %c0_25 = arith.constant 0 : index
    %c0_26 = arith.constant 0 : index
    %39 = vector.load %arg2[%c0_25, %c0_26] : memref<8x1xf32, #tpu.memory_space<vmem>>, vector<8x1xf32>
    %40 = arith.addf %39, %36 : vector<8x1xf32>
    %c0_27 = arith.constant 0 : index
    %c0_28 = arith.constant 0 : index
    %41 = vector.load %arg10[%c0_27, %c0_28] : memref<8x1xf32, #tpu.memory_space<vmem>>, vector<8x1xf32>
    tpu.vector_store %arg10[%c0_27, %c0_28], %40 {strides = array<i32>} : memref<8x1xf32, #tpu.memory_space<vmem>>, vector<8x1xf32>,
    return
  }
  func.func @transform_0(%arg0: i32) -> (i32, i32) {
    %c0_i32 = arith.constant 0 : i32
    %c0_i32_0 = arith.constant 0 : i32
    return %arg0, %c0_i32 : i32, i32
  }
  func.func @transform_1(%arg0: i32) -> (i32, i32) {
    %c0_i32 = arith.constant 0 : i32
    %c0_i32_0 = arith.constant 0 : i32
    return %arg0, %c0_i32 : i32, i32
  }
  func.func @transform_2(%arg0: i32) -> (i32, i32, i32) {
    %c0_i32 = arith.constant 0 : i32
    %c0_i32_0 = arith.constant 0 : i32
    %c0_i32_1 = arith.constant 0 : i32
    %c0_i32_2 = arith.constant 0 : i32
    return %c0_i32, %c0_i32_0, %c0_i32_1 : i32, i32, i32
  }
  func.func @transform_3(%arg0: i32) -> (i32, i32, i32) {
    %c0_i32 = arith.constant 0 : i32
    %c0_i32_0 = arith.constant 0 : i32
    %c0_i32_1 = arith.constant 0 : i32
    %c0_i32_2 = arith.constant 0 : i32
    return %c0_i32, %c0_i32_0, %c0_i32_1 : i32, i32, i32
  }
  func.func @transform_4(%arg0: i32) -> (i32, i32, i32) {
    %c0_i32 = arith.constant 0 : i32
    %c0_i32_0 = arith.constant 0 : i32
    %c0_i32_1 = arith.constant 0 : i32
    %c0_i32_2 = arith.constant 0 : i32
    return %c0_i32, %c0_i32_0, %c0_i32_1 : i32, i32, i32
  }
  func.func @transform_5(%arg0: i32) -> (i32, i32, i32) {
    %c0_i32 = arith.constant 0 : i32
    %c0_i32_0 = arith.constant 0 : i32
    %c0_i32_1 = arith.constant 0 : i32
    %c0_i32_2 = arith.constant 0 : i32
    return %c0_i32, %c0_i32_0, %c0_i32_1 : i32, i32, i32
  }
  func.func @transform_6(%arg0: i32) -> (i32, i32, i32) {
    %c0_i32 = arith.constant 0 : i32
    %c0_i32_0 = arith.constant 0 : i32
    %c0_i32_1 = arith.constant 0 : i32
    %c0_i32_2 = arith.constant 0 : i32
    return %c0_i32, %c0_i32_0, %c0_i32_1 : i32, i32, i32
  }
  func.func @transform_7(%arg0: i32) -> (i32, i32, i32) {
    %c0_i32 = arith.constant 0 : i32
    %c0_i32_0 = arith.constant 0 : i32
    %c0_i32_1 = arith.constant 0 : i32
    %c0_i32_2 = arith.constant 0 : i32
    return %c0_i32, %c0_i32_0, %c0_i32_1 : i32, i32, i32
  }
  func.func @transform_8(%arg0: i32) -> (i32, i32) {
    %c0_i32 = arith.constant 0 : i32
    %c0_i32_0 = arith.constant 0 : i32
    return %arg0, %c0_i32 : i32, i32
  }
  func.func @transform_9(%arg0: i32) -> (i32, i32) {
    %c0_i32 = arith.constant 0 : i32
    %c0_i32_0 = arith.constant 0 : i32
    return %arg0, %c0_i32 : i32, i32
  }
}

</mosaic_0001>

<bundles_post_ra>
// kernel: tpu_custom_call.1
= control target key start
LH: loop header
LB: loop body
LE: loop exit
PB: predicated region body
PF: predicated region fallthrough
CT: control target
= control target key end

     0   :  { %v369_v3 = vmov 0.0   ;;  %s370_s15 = smov 96   ;;  %vm55_vm0 = vcmask 261120   ;;  %v42_v63 = vlaneseq  ;;  %vm270_vm1 = vcmask 523264   ;;  %s575_s0 = inlined_call_operand.vmem [shape: f32[8,64], index: 0, kind: input, shape index: {}, may-alias: {0,8}]   ;;  %s576_s2 = inlined_call_operand.vmem [shape: f32[1,32,256], index: 2, kind: input, shape index: {}]   ;;  %s577_s4 = inlined_call_operand.vmem [shape: f32[1,256,64], index: 4, kind: input, shape index: {}]   ;;  %s578_s3 = inlined_call_operand.vmem [shape: f32[1,1,256], index: 3, kind: input, shape index: {}]   ;;  %s579_s5 = inlined_call_operand.vmem [shape: f32[1,1,64], index: 5, kind: input, shape index: {}]   ;;  %s580_s7 = inlined_call_operand.vmem [shape: f32[1,1,32], index: 7, kind: input, shape index: {}]   ;;  %s581_s6 = inlined_call_operand.vmem [shape: f32[1,1,32], index: 6, kind: input, shape index: {}]   ;;  %s582_s8 = inlined_call_operand.vmem [shape: f32[8,64], index: 8, kind: output, shape index: {0}, may-alias: {0,8}]   ;;  %s583_s1 = inlined_call_operand.vmem [shape: f32[8,1], index: 1, kind: input, shape index: {}, may-alias: {1,9}]   ;;  %s584_s9 = inlined_call_operand.vmem [shape: f32[8,1], index: 9, kind: output, shape index: {1}, may-alias: {1,9}]  }
   0x1   :  { %v424_v0 = vld [vmem:[%s575_s0] sm:$0xff]  ;;  %v33_v1 = vld [vmem:[%s576_s2 + $0x8] sm:$0xff]  ;;  %v35_v2 = vld [vmem:[%s576_s2 + $0x18] sm:$0xff]  ;;  %122 = vmatprep.mubr.f32.mxu0 %v369_v3  ;;  %vm274_vm2 = vcmask 7168  }
   0x2   :  { %53 = vrot.lane.b32.xlu0 %v424_v0, %s370_s15  ;;  %v323_v4 = vpack.c.bf16 %v35_v2, %v33_v1  ;;  %v32_v5 = vld [vmem:[%s576_s2] sm:$0xff]  ;;  %v34_v6 = vld [vmem:[%s576_s2 + $0x10] sm:$0xff]  ;;  %v37_v7 = vld [vmem:[%s576_s2 + $0x28] sm:$0xff]  ;;  %v43_v1 = vshrl.u32 %v42_v63, 7 }
   0x3   :  { %v325_v8 = vpack.c.bf16 %v34_v6, %v32_v5  ;;  %v39_v9 = vld [vmem:[%s576_s2 + $0x38] sm:$0xff]  ;;  %v36_v10 = vld [vmem:[%s576_s2 + $0x20] sm:$0xff]  ;;  %v38_v11 = vld [vmem:[%s576_s2 + $0x30] sm:$0xff] }
   0x4   :  { %324 = vmatprep.subr.bf16.mxu0 %v323_v4  ;;  %v327_v12 = vpack.c.bf16 %v39_v9, %v37_v7  ;;  %v147_v13 = vld [vmem:[%s577_s4 + $0x80] sm:$0xff]  ;;  %v148_v14 = vld [vmem:[%s577_s4 + $0x88] sm:$0xff]  ;;  %v329_v16 = vpack.c.bf16 %v38_v11, %v36_v10  ;;  %v149_v19 = vld [vmem:[%s577_s4 + $0x90] sm:$0xff]  ;;  %v44_v2 = vsub.s32 0, %v43_v1  ;;  %v48_v4 = vsub.s32 1, %v43_v1 }
   0x5   :  { %v131_v15 = vld [vmem:[%s577_s4] sm:$0xff]  ;;  %326 = vmatpush1.bf16.msra.mxu0 %v325_v8  ;;  %v331_v17 = vpack.c.bf16 %v148_v14, %v147_v13  ;;  %v132_v18 = vld [vmem:[%s577_s4 + $0x8] sm:$0xff]  ;;  %v150_v20 = vld [vmem:[%s577_s4 + $0x98] sm:$0xff] }
   0x6   :  { %328 = vmatprep.subr.bf16.mxu0 %v327_v12  ;;  %v333_v21 = vpack.c.bf16 %v132_v18, %v131_v15  ;;  %v335_v22 = vpack.c.bf16 %v150_v20, %v149_v19  ;;  %v133_v23 = vld [vmem:[%s577_s4 + $0x10] sm:$0xff]  ;;  %v134_v24 = vld [vmem:[%s577_s4 + $0x18] sm:$0xff]  ;;  %v151_v25 = vld [vmem:[%s577_s4 + $0xa0] sm:$0xff] }
   0x7   :  { %332 = vmatprep.subr.bf16.mxu1 %v331_v17  ;;  %v152_v26 = vld [vmem:[%s577_s4 + $0xa8] sm:$0xff]  ;;  %v337_v27 = vpack.c.bf16 %v134_v24, %v133_v23  ;;  %v135_v29 = vld [vmem:[%s577_s4 + $0x20] sm:$0xff]  ;;  %v153_v31 = vld [vmem:[%s577_s4 + $0xb0] sm:$0xff] }
   0x8   :  { %334 = vmatpush3.bf16.msra.mxu1 %v333_v21  ;;  %v339_v28 = vpack.c.bf16 %v152_v26, %v151_v25  ;;  %v136_v30 = vld [vmem:[%s577_s4 + $0x28] sm:$0xff]  ;;  %v154_v32 = vld [vmem:[%s577_s4 + $0xb8] sm:$0xff]  ;;  %v137_v35 = vld [vmem:[%s577_s4 + $0x30] sm:$0xff] }
   0x9   :  { %330 = vmatpush1.bf16.msra.mxu0 %v329_v16  ;;  %336 = vmatprep.subr.bf16.mxu1 %v335_v22  ;;  %v341_v33 = vpack.c.bf16 %v136_v30, %v135_v29  ;;  %v343_v34 = vpack.c.bf16 %v154_v32, %v153_v31  ;;  %v138_v36 = vld [vmem:[%s577_s4 + $0x38] sm:$0xff]  ;;  %v155_v37 = vld [vmem:[%s577_s4 + $0xc0] sm:$0xff]  ;;  %v156_v38 = vld [vmem:[%s577_s4 + $0xc8] sm:$0xff] }
   0xa   :  { %v345_v39 = vpack.c.bf16 %v138_v36, %v137_v35  ;;  %v347_v40 = vpack.c.bf16 %v156_v38, %v155_v37  ;;  %v139_v41 = vld [vmem:[%s577_s4 + $0x40] sm:$0xff]  ;;  %v140_v42 = vld [vmem:[%s577_s4 + $0x48] sm:$0xff]  ;;  %v157_v43 = vld [vmem:[%s577_s4 + $0xd0] sm:$0xff] }
   0xb   :  { %v158_v44 = vld [vmem:[%s577_s4 + $0xd8] sm:$0xff]  ;;  %v349_v45 = vpack.c.bf16 %v140_v42, %v139_v41  ;;  %v141_v47 = vld [vmem:[%s577_s4 + $0x50] sm:$0xff]  ;;  %v159_v49 = vld [vmem:[%s577_s4 + $0xe0] sm:$0xff] }
   0xc   :  { %338 = vmatpush3.bf16.msra.mxu1 %v337_v27  ;;  %v351_v46 = vpack.c.bf16 %v158_v44, %v157_v43  ;;  %v142_v48 = vld [vmem:[%s577_s4 + $0x58] sm:$0xff]  ;;  %v160_v50 = vld [vmem:[%s577_s4 + $0xe8] sm:$0xff]  ;;  %v143_v54 = vld [vmem:[%s577_s4 + $0x60] sm:$0xff] }
   0xd   :  { %340 = vmatprep.subr.bf16.mxu1 %v339_v28  ;;  %v353_v51 = vpack.c.bf16 %v142_v48, %v141_v47  ;;  %v355_v52 = vpack.c.bf16 %v160_v50, %v159_v49  ;;  %v144_v55 = vld [vmem:[%s577_s4 + $0x68] sm:$0xff]  ;;  %v161_v57 = vld [vmem:[%s577_s4 + $0xf0] sm:$0xff]  ;;  %v162_v58 = vld [vmem:[%s577_s4 + $0xf8] sm:$0xff] }
   0xe   :  { %v357_v56 = vpack.c.bf16 %v144_v55, %v143_v54  ;;  %v359_v59 = vpack.c.bf16 %v162_v58, %v161_v57  ;;  %v145_v60 = vld [vmem:[%s577_s4 + $0x70] sm:$0xff]  ;;  %v146_v61 = vld [vmem:[%s577_s4 + $0x78] sm:$0xff]  ;;  %v40_v3 = vld [vmem:[%s578_s3] sm:$0x3] }
   0xf   :  { %v361_v62 = vpack.c.bf16 %v146_v61, %v145_v60  ;;  %v45_v5 = vrot.slane %v40_v3, %v44_v2  ;;  %v49_v6 = vrot.slane %v40_v3, %v48_v4  ;;  %v285_v15 = vld [vmem:[%s579_s5] ss:$0 sm:$0xff] }
  0x10   :  { %342 = vmatpush3.bf16.msra.mxu1 %v341_v33  ;;  %v286_v17 = vld [vmem:[%s580_s7] ss:$0 sm:$0xff] }
  0x11   :  { %344 = vmatprep.subr.bf16.mxu1 %v343_v34  ;;  %v287_v20 = vld [vmem:[%s581_s6] ss:$0 sm:$0xff] }
  0x12   :  { %v272_v30 = vld [vmem:[%s583_s1] sm:$0xff] }
  0x14   :  { %346 = vmatpush3.bf16.msra.mxu1 %v345_v39 }
  0x15   :  { %348 = vmatprep.subr.bf16.mxu1 %v347_v40 }
  0x18   :  { %350 = vmatpush3.bf16.msra.mxu1 %v349_v45 }
  0x19   :  { %352 = vmatprep.subr.bf16.mxu1 %v351_v46 }
  0x1c   :  { %354 = vmatpush3.bf16.msra.mxu1 %v353_v51 }
  0x1d   :  { %356 = vmatprep.subr.bf16.mxu1 %v355_v52 }
  0x20   :  { %358 = vmatpush3.bf16.msra.mxu1 %v357_v56 }
  0x21   :  { %360 = vmatprep.subr.bf16.mxu1 %v359_v59 }
  0x24   :  { %362 = vmatpush3.bf16.msra.mxu1 %v361_v62 }
  0x74   :  { %v54_v53 = vpop.permute.xlu0 %53 }
  0x75   :  { %284 = vmatmul.mubr.msk.f32.vlgmr.msra.gmra.mrb[0].mxu0 %vm55_vm0, %v54_v53 }
 0x148   :  { %v124_v7 = vpop.f32.mrb[0].mxu0 }
 0x149   :  { %v125_v8 = vadd.f32 %v124_v7, %v45_v5  ;;  %v126_v9 = vpop.f32.mrb[1].mxu0 }
 0x14a   :  { %v127_v10 = vadd.f32 %v126_v9, %v49_v6 }
 0x14b   :  { %v129_v12 = vmax.f32 %v125_v8, 0.0 }
 0x14c   :  { %v130_v11 = vmax.f32 %v127_v10, 0.0 }
 0x14e   :  { %234 = vmatprep.mubr.f32.mxu1 %v130_v11 }
 0x14f   :  { %235 = vmatmul.mubr.f32.vlgmr.msra.gmra.mrb[0].mxu1 %v129_v12 }
 0x222   :  { %v320_v13 = vpop.f32.mrb[0].mxu1 }
 0x223   :  { %v321_v14 = vpop.f32.mrb[1].mxu1 }
 0x224   :  { %v322_v16 = vadd.f32 %v321_v14, %v320_v13 }
 0x226   :  { %v237_v18 = vadd.f32 %v322_v16, %v285_v15 }
 0x228   :  { %258 = vrot.lane.b32.xlu1 %v237_v18, %s370_s15  ;;  %v247_v19 = vmul.f32 %v286_v17, %v237_v18 }
 0x22a   :  { %365 = vtanh.f32 %v247_v19 }
 0x234   :  { %v366_v21 = vpop.eup %365 }
 0x235   :  { %v256_v22 = vmul.f32 %v366_v21, %v287_v20 }
 0x237   :  { %v265_v23 = vsel %vm55_vm0, %v256_v22, 0.0  ;;  %v262_v24 = vmul.f32 1.442695, %v256_v22 }
 0x238   :  { %266 = vadd.xlane.f32.xlu0 %v265_v23 }
 0x239   :  { %367 = vpow2.f32 %v262_v24 }
 0x243   :  { %v368_v27 = vpop.eup %367 }
 0x29a   :  { %v259_v25 = vpop.permute.xlu1 %258 }
 0x29b   :  { %v261_v26 = vadd.f32 %v259_v25, %v424_v0 }
 0x29d   :  { %v264_v28 = vmul.f32 %v368_v27, %v261_v26 }
 0x29f   :  { %v269_v29 = vsel %vm55_vm0, %v264_v28, %v424_v0 }
 0x2a0   :  { %271 = vst.msk [vmem:[%s582_s8] sm:$0xff] %vm270_vm1, %v269_v29 }
 0x2c5   :  { %v267_v31 = vpop.xlane.xlu0 %266 }
 0x2c6   :  { %v273_v32 = vadd.f32 %v272_v30, %v267_v31 }
 0x2c8   :  { %275 = vst.msk [vmem:[%s584_s9] sm:$0xff] %vm274_vm2, %v273_v32 }

</bundles_post_ra>
